<compile_context>
chip_gen: v7x
topology: tpu7x:2x2x1
jax: 0.10.0
libtpu: 0.0.40
codegen_flags: <defaults>
</compile_context>

<pallas_src>
import functools

import jax
import jax.numpy as jnp
from jax import lax
from jax.experimental import pallas as pl
from jax.experimental.pallas import tpu as pltpu


# ----------------------------------------------------------------------------
# Kernel A: VLAD aggregation over the point/sample axis N.
# ----------------------------------------------------------------------------
def _vlad_agg_kernel(x_ref, wc_ref, bn1s_ref, bn1b_ref, c2_ref, out_ref,
                     acc_ref, asum_ref, *, n_valid, tile_n):
    t = pl.program_id(1)

    @pl.when(t == 0)
    def _():
        acc_ref[...] = jnp.zeros_like(acc_ref)
        asum_ref[...] = jnp.zeros_like(asum_ref)

    x = x_ref[...]                                                  # (tile_n, F) native dtype

    # Soft cluster assignment: (tile_n, K) on the MXU, f32 accumulate.
    act = jnp.dot(x, wc_ref[...], preferred_element_type=jnp.float32)
    act = act * bn1s_ref[...] + bn1b_ref[...]                       # folded BatchNorm1d(K)
    # numerically stable softmax over clusters
    act = act - jnp.max(act, axis=-1, keepdims=True)
    act = jnp.exp(act)
    act = act / jnp.sum(act, axis=-1, keepdims=True)

    # Mask only the rows that come from rounding N_max up to tile_n (rows that
    # pad_sequence itself created are intentionally kept, matching PyTorch).
    row = t * tile_n + lax.broadcasted_iota(jnp.int32, act.shape, 0)
    act = jnp.where(row < n_valid, act, 0.0)

    asum_ref[...] += jnp.sum(act, axis=0, keepdims=True)            # (1, K)
    # Residual numerator x^T @ act -> (F, K); contraction over tile_n on the MXU.
    acc_ref[...] += lax.dot_general(
        x, act.astype(x.dtype),
        dimension_numbers=(((0,), (0,)), ((), ())),
        preferred_element_type=jnp.float32)

    @pl.when(t == pl.num_programs(1) - 1)
    def _():
        vlad = acc_ref[...] - asum_ref[...] * c2_ref[...]           # (F, K)
        # intra-normalization: L2 over the feature dim, per cluster
        norm = jnp.sqrt(jnp.sum(vlad * vlad, axis=0, keepdims=True))
        vlad = vlad / jnp.maximum(norm, 1e-12)
        out_ref[...] = vlad.astype(out_ref.dtype)


def netvlad_aggregate(x, wc, bn1_scale, bn1_bias, c2, *, tile_n=512):
    """x: (B, N_max, F) zero-padded features. Returns intra-normalized VLAD (B, F, K)."""
    b, n_max, f = x.shape
    k = wc.shape[1]

    # tile_n: multiple of 8, no larger than needed; cap keeps 2x(tile_n*F*dtype)
    # + F*K*4 well inside v7x's 64 MiB VMEM for realistic F.
    tile_n = max(8, min(tile_n, n_max))
    tile_n = ((tile_n + 7) // 8) * 8
    n_pad = pl.cdiv(n_max, tile_n) * tile_n
    if n_pad != n_max:
        x = jnp.pad(x, ((0, 0), (0, n_pad - n_max), (0, 0)))
    n_tiles = n_pad // tile_n

    kernel = functools.partial(_vlad_agg_kernel, n_valid=n_max, tile_n=tile_n)

    return pl.pallas_call(
        kernel,
        out_shape=jax.ShapeDtypeStruct((b, f, k), jnp.float32),
        grid_spec=pltpu.PrefetchScalarGridSpec(
            num_scalar_prefetch=0,
            grid=(b, n_tiles),
            in_specs=[
                pl.BlockSpec((None, tile_n, f), lambda bb, t: (bb, t, 0)),  # features tile
                pl.BlockSpec((f, k), lambda bb, t: (0, 0)),                 # cluster_weights
                pl.BlockSpec((1, k), lambda bb, t: (0, 0)),                 # bn1 scale
                pl.BlockSpec((1, k), lambda bb, t: (0, 0)),                 # bn1 bias
                pl.BlockSpec((f, k), lambda bb, t: (0, 0)),                 # cluster_weights2
            ],
            out_specs=pl.BlockSpec((None, f, k), lambda bb, t: (bb, 0, 0)),
            scratch_shapes=[
                pltpu.VMEM((f, k), jnp.float32),   # running residual accumulator
                pltpu.VMEM((1, k), jnp.float32),   # running per-cluster assignment sums
            ],
        ),
        compiler_params=pltpu.CompilerParams(
            dimension_semantics=("parallel", "arbitrary"),   # batch parallel, N reduction
        ),
    )(x, wc, bn1_scale, bn1_bias, c2)


# ----------------------------------------------------------------------------
# Kernel B: head (final L2 norm, hidden projection, BN2, context gating).
# ----------------------------------------------------------------------------
def _vlad_head_kernel(v_ref, wh_ref, bn2s_ref, bn2b_ref, wg_ref, gbs_ref, gbb_ref,
                      out_ref, *, gating):
    v = v_ref[...].astype(jnp.float32)                               # (B, F*K)
    norm = jnp.sqrt(jnp.sum(v * v, axis=-1, keepdims=True))
    v = v / jnp.maximum(norm, 1e-12)

    h = jnp.dot(v, wh_ref[...], preferred_element_type=jnp.float32)  # (B, D)
    h = h * bn2s_ref[...] + bn2b_ref[...]                            # folded BatchNorm1d(D)

    if gating:  # static python flag
        g = jnp.dot(h, wg_ref[...], preferred_element_type=jnp.float32)
        g = g * gbs_ref[...] + gbb_ref[...]                          # folded gating BN
        h = h * jax.nn.sigmoid(g)

    out_ref[...] = h.astype(out_ref.dtype)


def netvlad_head(vlad_flat, wh, bn2_scale, bn2_bias, wg, gbn_scale, gbn_bias, *, gating=True):
    b, fk = vlad_flat.shape
    d = wh.shape[1]
    kernel = functools.partial(_vlad_head_kernel, gating=gating)
    return pl.pallas_call(
        kernel,
        out_shape=jax.ShapeDtypeStruct((b, d), jnp.float32),
        grid_spec=pltpu.PrefetchScalarGridSpec(
            num_scalar_prefetch=0,
            grid=(1,),
            in_specs=[
                pl.BlockSpec((b, fk), lambda i: (0, 0)),
                pl.BlockSpec((fk, d), lambda i: (0, 0)),
                pl.BlockSpec((1, d), lambda i: (0, 0)),
                pl.BlockSpec((1, d), lambda i: (0, 0)),
                pl.BlockSpec((d, d), lambda i: (0, 0)),
                pl.BlockSpec((1, d), lambda i: (0, 0)),
                pl.BlockSpec((1, d), lambda i: (0, 0)),
            ],
            out_specs=pl.BlockSpec((b, d), lambda i: (0, 0)),
        ),
        compiler_params=pltpu.CompilerParams(dimension_semantics=("arbitrary",)),
    )(vlad_flat, wh, bn2_scale, bn2_bias, wg, gbn_scale, gbn_bias)


# ----------------------------------------------------------------------------
# Host-side prep: ME.SparseTensor.decomposed_features + pad_sequence equivalent.
# ----------------------------------------------------------------------------
def pad_decomposed_features(feats, batch_ids, num_batches):
    """(N_total, F) + batch ids -> zero-padded (B, N_max, F), preserving per-batch order."""
    onehot = (batch_ids[:, None] == jnp.arange(num_batches)[None, :]).astype(jnp.int32)
    pos = jnp.take_along_axis(jnp.cumsum(onehot, axis=0) - 1,
                              batch_ids[:, None].astype(jnp.int32), axis=1)[:, 0]
    counts = jnp.sum(onehot, axis=0)
    n_max = int(jnp.max(counts))
    padded = jnp.zeros((num_batches, n_max, feats.shape[1]), feats.dtype)
    padded = padded.at[batch_ids, pos].set(feats)
    return padded


# ----------------------------------------------------------------------------
# Module wrapper (parameters + forward), mirroring NetVLADWrapper / NetVLADLoupe.
# ----------------------------------------------------------------------------
class NetVLADWrapperPallas:
    def __init__(self, key, feature_size, output_dim, gating=True, cluster_size=64):
        self.feature_size = feature_size
        self.output_dim = output_dim
        self.cluster_size = cluster_size
        self.gating = gating

        f, k, d = feature_size, cluster_size, output_dim
        ks = jax.random.split(key, 10)
        p = {}
        p["wc"] = jax.random.normal(ks[0], (f, k), jnp.float32) / jnp.sqrt(f)
        p["c2"] = jax.random.normal(ks[1], (f, k), jnp.float32) / jnp.sqrt(f)
        p["wh"] = jax.random.normal(ks[2], (f * k, d), jnp.float32) / jnp.sqrt(f)
        # BatchNorm layers folded to inference-mode (scale, bias).
        p["bn1_scale"] = 1.0 + 0.1 * jax.random.normal(ks[3], (1, k), jnp.float32)
        p["bn1_bias"] = 0.1 * jax.random.normal(ks[4], (1, k), jnp.float32)
        p["bn2_scale"] = 1.0 + 0.1 * jax.random.normal(ks[5], (1, d), jnp.float32)
        p["bn2_bias"] = 0.1 * jax.random.normal(ks[6], (1, d), jnp.float32)
        p["wg"] = jax.random.normal(ks[7], (d, d), jnp.float32) / jnp.sqrt(d)
        p["gbn_scale"] = 1.0 + 0.1 * jax.random.normal(ks[8], (1, d), jnp.float32)
        p["gbn_bias"] = 0.1 * jax.random.normal(ks[9], (1, d), jnp.float32)
        self.params = p

    def __call__(self, feats, batch_ids, num_batches, *, tile_n=512):
        assert feats.shape[1] == self.feature_size
        p = self.params
        padded = pad_decomposed_features(feats, batch_ids, num_batches)       # (B, N_max, F)
        vlad = netvlad_aggregate(padded, p["wc"], p["bn1_scale"], p["bn1_bias"],
                                 p["c2"], tile_n=tile_n)                       # (B, F, K)
        # Row-major contiguous -> free metadata reshape, no HBM copy.
        vlad_flat = vlad.reshape(num_batches, self.feature_size * self.cluster_size)
        out = netvlad_head(vlad_flat, p["wh"], p["bn2_scale"], p["bn2_bias"],
                           p["wg"], p["gbn_scale"], p["gbn_bias"], gating=self.gating)
        assert out.shape == (num_batches, self.output_dim)
        return out


# ----------------------------------------------------------------------------
# Pure-JAX reference of NetVLADLoupe forward (for correctness check).
# ----------------------------------------------------------------------------
def netvlad_loupe_reference(padded, p, gating=True):
    hp = jax.lax.Precision.HIGHEST
    x = padded.astype(jnp.float32)
    b, n, f = x.shape
    k = p["wc"].shape[1]
    act = jnp.einsum("bnf,fk->bnk", x, p["wc"], precision=hp)
    act = act * p["bn1_scale"][None] + p["bn1_bias"][None]
    act = jax.nn.softmax(act, axis=-1)
    a_sum = jnp.sum(act, axis=1, keepdims=True)                       # (B, 1, K)
    a = a_sum * p["c2"][None]                                         # (B, F, K)
    vlad = jnp.einsum("bnk,bnf->bfk", act, x, precision=hp) - a
    vlad = vlad / jnp.maximum(jnp.linalg.norm(vlad, axis=1, keepdims=True), 1e-12)
    vlad = vlad.reshape(b, f * k)
    vlad = vlad / jnp.maximum(jnp.linalg.norm(vlad, axis=1, keepdims=True), 1e-12)
    h = jnp.einsum("bi,ij->bj", vlad, p["wh"], precision=hp)
    h = h * p["bn2_scale"] + p["bn2_bias"]
    if gating:
        g = jnp.einsum("bd,de->be", h, p["wg"], precision=hp)
        g = g * p["gbn_scale"] + p["gbn_bias"]
        h = h * jax.nn.sigmoid(g)
    return h


if __name__ == "__main__":
    key = jax.random.PRNGKey(0)
    k_feat, k_bidx, k_model = jax.random.split(key, 3)

    feature_size = 32     # F
    output_dim = 64       # D
    num_batches = 2       # B
    num_points = 140      # total sparse points across the batch (cluster_size=64 fixed)

    feats = jax.random.normal(k_feat, (num_points, feature_size), dtype=jnp.float32)
    batch_ids = jax.random.randint(k_bidx, (num_points,), 0, num_batches, dtype=jnp.int32)

    model = NetVLADWrapperPallas(k_model, feature_size=feature_size,
                                 output_dim=output_dim, gating=True)
    out = model(feats, batch_ids, num_batches)
    out = jax.block_until_ready(out)

    padded = pad_decomposed_features(feats, batch_ids, num_batches)
    ref = netvlad_loupe_reference(padded, model.params, gating=True)

    assert out.shape == (num_batches, output_dim)
    assert jnp.allclose(out, ref, atol=2e-3, rtol=2e-3), float(jnp.max(jnp.abs(out - ref)))

    print("KERNEL_OK")
</pallas_src>

<mosaic_0001>
module attributes {stable_mosaic.version = 11 : i64} {
  func.func @_vlad_agg_kernel(%arg0: i32, %arg1: i32, %arg2: memref<1x80x32xf32, #tpu.memory_space<vmem>>, %arg3: memref<32x64xf32, #tpu.memory_space<vmem>>, %arg4: memref<1x64xf32, #tpu.memory_space<vmem>>, %arg5: memref<1x64xf32, #tpu.memory_space<vmem>>, %arg6: memref<32x64xf32, #tpu.memory_space<vmem>>, %arg7: memref<1x32x64xf32, #tpu.memory_space<vmem>>, %arg8: memref<32x64xf32, #tpu.memory_space<vmem>>, %arg9: memref<1x64xf32, #tpu.memory_space<vmem>>) attributes {dimension_semantics = [#tpu.dimension_semantics<parallel>, #tpu.dimension_semantics<arbitrary>], iteration_bounds = array<i64: 2, 1>, scalar_prefetch = 0 : i64, scratch_operands = 2 : i64, tpu.core_type = #tpu.core_type<tc>, window_params = [{transform_indices = @transform_0, window_bounds = array<i64: 1, 80, 32>}, {pipeline_mode = #tpu.pipeline_mode<synchronous>, transform_indices = @transform_1, window_bounds = array<i64: 32, 64>}, {pipeline_mode = #tpu.pipeline_mode<synchronous>, transform_indices = @transform_2, window_bounds = array<i64: 1, 64>}, {pipeline_mode = #tpu.pipeline_mode<synchronous>, transform_indices = @transform_3, window_bounds = array<i64: 1, 64>}, {pipeline_mode = #tpu.pipeline_mode<synchronous>, transform_indices = @transform_4, window_bounds = array<i64: 32, 64>}, {transform_indices = @transform_5, window_bounds = array<i64: 1, 32, 64>}]} {
    %c0_i32 = arith.constant 0 : i32
    %0 = arith.cmpi eq, %arg1, %c0_i32 : i32
    %1 = arith.extui %0 : i1 to i32
    %c0_i32_0 = arith.constant 0 : i32
    %2 = arith.cmpi ne, %1, %c0_i32_0 : i32
    scf.if %2 {
      %cst_24 = arith.constant 0.000000e+00 : f32
      %42 = vector.broadcast %cst_24 : f32 to vector<32x64xf32>
      %c0_25 = arith.constant 0 : index
      %c0_26 = arith.constant 0 : index
      %43 = vector.load %arg8[%c0_25, %c0_26] : memref<32x64xf32, #tpu.memory_space<vmem>>, vector<32x64xf32>
      tpu.vector_store %arg8[%c0_25, %c0_26], %42 {strides = array<i32>} : memref<32x64xf32, #tpu.memory_space<vmem>>, vector<32x64xf32>,
      %cst_27 = arith.constant 0.000000e+00 : f32
      %44 = vector.broadcast %cst_27 : f32 to vector<1x64xf32>
      %c0_28 = arith.constant 0 : index
      %c0_29 = arith.constant 0 : index
      %45 = vector.load %arg9[%c0_28, %c0_29] : memref<1x64xf32, #tpu.memory_space<vmem>>, vector<1x64xf32>
      tpu.vector_store %arg9[%c0_28, %c0_29], %44 {strides = array<i32>} : memref<1x64xf32, #tpu.memory_space<vmem>>, vector<1x64xf32>,
    } else {
    }
    %c0 = arith.constant 0 : index
    %c0_1 = arith.constant 0 : index
    %c0_2 = arith.constant 0 : index
    %3 = vector.load %arg2[%c0, %c0_1, %c0_2] : memref<1x80x32xf32, #tpu.memory_space<vmem>>, vector<1x80x32xf32>
    %4 = vector.shape_cast %3 : vector<1x80x32xf32> to vector<80x32xf32>
    %c0_3 = arith.constant 0 : index
    %c0_4 = arith.constant 0 : index
    %5 = vector.load %arg3[%c0_3, %c0_4] : memref<32x64xf32, #tpu.memory_space<vmem>>, vector<32x64xf32>
    %cst = arith.constant dense<0.000000e+00> : vector<80x64xf32>
    %6 = tpu.matmul %4, %5, %cst {dimension_numbers = #tpu.dot_dimension_numbers<[1], [0], [0], [1], [0, 0, 1, 1], [], []>} : vector<80x32xf32>, vector<32x64xf32>, vector<80x64xf32> -> vector<80x64xf32>
    %c0_5 = arith.constant 0 : index
    %c0_6 = arith.constant 0 : index
    %7 = vector.load %arg4[%c0_5, %c0_6] : memref<1x64xf32, #tpu.memory_space<vmem>>, vector<1x64xf32>
    %8 = vector.broadcast %7 : vector<1x64xf32> to vector<80x64xf32>
    %9 = arith.mulf %6, %8 : vector<80x64xf32>
    %c0_7 = arith.constant 0 : index
    %c0_8 = arith.constant 0 : index
    %10 = vector.load %arg5[%c0_7, %c0_8] : memref<1x64xf32, #tpu.memory_space<vmem>>, vector<1x64xf32>
    %11 = vector.broadcast %10 : vector<1x64xf32> to vector<80x64xf32>
    %12 = arith.addf %9, %11 : vector<80x64xf32>
    %cst_9 = arith.constant dense<0xFF800000> : vector<80xf32>
    %13 = vector.multi_reduction <maximumf>, %12, %cst_9 [1] : vector<80x64xf32> to vector<80xf32>
    %14 = vector.shape_cast %13 : vector<80xf32> to vector<80x1xf32>
    %15 = vector.broadcast %14 : vector<80x1xf32> to vector<80x64xf32>
    %16 = arith.subf %12, %15 : vector<80x64xf32>
    %17 = math.exp %16 : vector<80x64xf32>
    %cst_10 = arith.constant dense<0.000000e+00> : vector<80xf32>
    %18 = vector.multi_reduction <add>, %17, %cst_10 [1] : vector<80x64xf32> to vector<80xf32>
    %19 = vector.shape_cast %18 : vector<80xf32> to vector<80x1xf32>
    %20 = vector.broadcast %19 : vector<80x1xf32> to vector<80x64xf32>
    %21 = arith.divf %17, %20 : vector<80x64xf32>
    %c80_i32 = arith.constant 80 : i32
    %22 = arith.muli %arg1, %c80_i32 : i32
    %23 = tpu.iota {dimensions = array<i32: 0>} : vector<80x64xi32>
    %24 = vector.broadcast %22 : i32 to vector<80x64xi32>
    %25 = arith.addi %24, %23 : vector<80x64xi32>
    %c73_i32 = arith.constant 73 : i32
    %26 = vector.broadcast %c73_i32 : i32 to vector<80x64xi32>
    %27 = arith.cmpi slt, %25, %26 : vector<80x64xi32>
    %cst_11 = arith.constant 0.000000e+00 : f32
    %28 = vector.broadcast %cst_11 : f32 to vector<80x64xf32>
    %29 = arith.select %27, %21, %28 : vector<80x64xi1>, vector<80x64xf32>
    %c0_12 = arith.constant 0 : index
    %c0_13 = arith.constant 0 : index
    %30 = vector.load %arg9[%c0_12, %c0_13] : memref<1x64xf32, #tpu.memory_space<vmem>>, vector<1x64xf32>
    %cst_14 = arith.constant dense<0.000000e+00> : vector<64xf32>
    %31 = vector.multi_reduction <add>, %29, %cst_14 [0] : vector<80x64xf32> to vector<64xf32>
    %32 = vector.shape_cast %31 : vector<64xf32> to vector<1x64xf32>
    %33 = arith.addf %30, %32 : vector<1x64xf32>
    %c0_15 = arith.constant 0 : index
    %c0_16 = arith.constant 0 : index
    %34 = vector.load %arg9[%c0_15, %c0_16] : memref<1x64xf32, #tpu.memory_space<vmem>>, vector<1x64xf32>
    tpu.vector_store %arg9[%c0_15, %c0_16], %33 {strides = array<i32>} : memref<1x64xf32, #tpu.memory_space<vmem>>, vector<1x64xf32>,
    %c0_17 = arith.constant 0 : index
    %c0_18 = arith.constant 0 : index
    %35 = vector.load %arg8[%c0_17, %c0_18] : memref<32x64xf32, #tpu.memory_space<vmem>>, vector<32x64xf32>
    %cst_19 = arith.constant dense<0.000000e+00> : vector<32x64xf32>
    %36 = tpu.matmul %4, %29, %cst_19 {dimension_numbers = #tpu.dot_dimension_numbers<[0], [0], [1], [1], [0, 1, 1, 1], [], []>} : vector<80x32xf32>, vector<80x64xf32>, vector<32x64xf32> -> vector<32x64xf32>
    %37 = arith.addf %35, %36 : vector<32x64xf32>
    %c0_20 = arith.constant 0 : index
    %c0_21 = arith.constant 0 : index
    %38 = vector.load %arg8[%c0_20, %c0_21] : memref<32x64xf32, #tpu.memory_space<vmem>>, vector<32x64xf32>
    tpu.vector_store %arg8[%c0_20, %c0_21], %37 {strides = array<i32>} : memref<32x64xf32, #tpu.memory_space<vmem>>, vector<32x64xf32>,
    %c0_i32_22 = arith.constant 0 : i32
    %39 = arith.cmpi eq, %arg1, %c0_i32_22 : i32
    %40 = arith.extui %39 : i1 to i32
    %c0_i32_23 = arith.constant 0 : i32
    %41 = arith.cmpi ne, %40, %c0_i32_23 : i32
    scf.if %41 {
      %c0_24 = arith.constant 0 : index
      %c0_25 = arith.constant 0 : index
      %42 = vector.load %arg8[%c0_24, %c0_25] : memref<32x64xf32, #tpu.memory_space<vmem>>, vector<32x64xf32>
      %c0_26 = arith.constant 0 : index
      %c0_27 = arith.constant 0 : index
      %43 = vector.load %arg9[%c0_26, %c0_27] : memref<1x64xf32, #tpu.memory_space<vmem>>, vector<1x64xf32>
      %c0_28 = arith.constant 0 : index
      %c0_29 = arith.constant 0 : index
      %44 = vector.load %arg6[%c0_28, %c0_29] : memref<32x64xf32, #tpu.memory_space<vmem>>, vector<32x64xf32>
      %45 = vector.broadcast %43 : vector<1x64xf32> to vector<32x64xf32>
      %46 = arith.mulf %45, %44 : vector<32x64xf32>
      %47 = arith.subf %42, %46 : vector<32x64xf32>
      %48 = arith.mulf %47, %47 : vector<32x64xf32>
      %cst_30 = arith.constant dense<0.000000e+00> : vector<64xf32>
      %49 = vector.multi_reduction <add>, %48, %cst_30 [0] : vector<32x64xf32> to vector<64xf32>
      %50 = vector.shape_cast %49 : vector<64xf32> to vector<1x64xf32>
      %51 = math.sqrt %50 : vector<1x64xf32>
      %cst_31 = arith.constant 9.99999996E-13 : f32
      %52 = vector.broadcast %cst_31 : f32 to vector<1x64xf32>
      %53 = arith.maximumf %51, %52 : vector<1x64xf32>
      %54 = vector.broadcast %53 : vector<1x64xf32> to vector<32x64xf32>
      %55 = arith.divf %47, %54 : vector<32x64xf32>
      %c0_32 = arith.constant 0 : index
      %c0_33 = arith.constant 0 : index
      %c0_34 = arith.constant 0 : index
      %56 = vector.load %arg7[%c0_32, %c0_33, %c0_34] : memref<1x32x64xf32, #tpu.memory_space<vmem>>, vector<1x32x64xf32>
      %57 = vector.shape_cast %56 : vector<1x32x64xf32> to vector<32x64xf32>
      %58 = vector.shape_cast %55 : vector<32x64xf32> to vector<1x32x64xf32>
      tpu.vector_store %arg7[%c0_32, %c0_33, %c0_34], %58 {strides = array<i32>} : memref<1x32x64xf32, #tpu.memory_space<vmem>>, vector<1x32x64xf32>,
    } else {
    }
    return
  }
  func.func @transform_0(%arg0: i32, %arg1: i32) -> (i32, i32, i32) {
    %c0_i32 = arith.constant 0 : i32
    %c0_i32_0 = arith.constant 0 : i32
    return %arg0, %arg1, %c0_i32 : i32, i32, i32
  }
  func.func @transform_1(%arg0: i32, %arg1: i32) -> (i32, i32) {
    %c0_i32 = arith.constant 0 : i32
    %c0_i32_0 = arith.constant 0 : i32
    %c0_i32_1 = arith.constant 0 : i32
    return %c0_i32, %c0_i32_0 : i32, i32
  }
  func.func @transform_2(%arg0: i32, %arg1: i32) -> (i32, i32) {
    %c0_i32 = arith.constant 0 : i32
    %c0_i32_0 = arith.constant 0 : i32
    %c0_i32_1 = arith.constant 0 : i32
    return %c0_i32, %c0_i32_0 : i32, i32
  }
  func.func @transform_3(%arg0: i32, %arg1: i32) -> (i32, i32) {
    %c0_i32 = arith.constant 0 : i32
    %c0_i32_0 = arith.constant 0 : i32
    %c0_i32_1 = arith.constant 0 : i32
    return %c0_i32, %c0_i32_0 : i32, i32
  }
  func.func @transform_4(%arg0: i32, %arg1: i32) -> (i32, i32) {
    %c0_i32 = arith.constant 0 : i32
    %c0_i32_0 = arith.constant 0 : i32
    %c0_i32_1 = arith.constant 0 : i32
    return %c0_i32, %c0_i32_0 : i32, i32
  }
  func.func @transform_5(%arg0: i32, %arg1: i32) -> (i32, i32, i32) {
    %c0_i32 = arith.constant 0 : i32
    %c0_i32_0 = arith.constant 0 : i32
    %c0_i32_1 = arith.constant 0 : i32
    return %arg0, %c0_i32, %c0_i32_0 : i32, i32, i32
  }
}

</mosaic_0001>

<bundles_post_ra>
// kernel: tpu_custom_call.1
= control target key start
LH: loop header
LB: loop body
LE: loop exit
PB: predicated region body
PF: predicated region fallthrough
CT: control target
= control target key end

     0   :  { %10 = vsyncpa [#allocation5], 0  ;;  %s1571_s0 = inlined_call_operand.vmem [shape: f32[2,80,32], index: 0, kind: input, shape index: {}]   ;;  %s1572_s1 = inlined_call_operand.vmem [shape: f32[32,64], index: 1, kind: input, shape index: {}]   ;;  %s1573_s2 = inlined_call_operand.vmem [shape: f32[1,64], index: 2, kind: input, shape index: {}]   ;;  %s1574_s3 = inlined_call_operand.vmem [shape: f32[1,64], index: 3, kind: input, shape index: {}]   ;;  %s1575_s4 = inlined_call_operand.vmem [shape: f32[32,64], index: 4, kind: input, shape index: {}]   ;;  %s1576_s5 = inlined_call_operand.hbm [shape: f32[2,32,64], index: 5, kind: output, shape index: {}]  }
   0x1   :  { %12 = vsyncpa [#allocation5 + $0x1], 0  ;;  %s1288_s18 = smov 0   ;;  %s1290_s19 = smov 0  }
   0x2   :  { %s1292_s20 = smov 0   ;;  %s1294_s21 = smov 0  }
   0x3   :  { %s1296_s22 = smov 0   ;;  %s1298_s23 = smov 0  }
   0x4 LB: > { %s931_s24 = sadd.s32 4294967295, %s1251_s23   ;;  %s932_s25 = sadd.s32 4294967294, %s1251_s23   ;;  %s1251_s23 = sphi %s1298_s23, %s18_s23   ;;  %s1247_s22 = sphi %s1296_s22, %s1583_s22   ;;  %s1243_s21 = sphi %s1294_s21, %s1582_s21   ;;  %s1239_s20 = sphi %s1292_s20, %s1581_s20   ;;  %s1235_s19 = sphi %s1290_s19, %s1580_s19   ;;  %s1231_s18 = sphi %s1288_s18, %s1579_s18  }
   0x5   : > { %s30_s26 = sadd.s32 1, %s1247_s22  ;;  %s149_s27 = sadd.s32 1, %s1239_s20 }
   0x6   : > { %p32_p0 = scmp.ge.s32.totalorder %s30_s26, 2  ;;  %p159_p1 = scmp.ne.s32.totalorder %s1239_s20, %s1235_s19 }
   0x7   : > { %p160_p2 = scmp.eq.s32.totalorder %s931_s24, 1  ;;  %p165_p3 = scmp.ne.s32.totalorder %s1235_s19, %s1231_s18 }
   0x8   : > { %s1585_s26 = smov (%p32_p0, %s30_s26), 0  ;;  %p166_p5 = scmp.eq.s32.totalorder %s932_s25, 1 }
   0x9   : > { %p1328_p4 = por %p160_p2, %p159_p1  ;;  %s146_s29 = ssub.s32 %s1247_s22, %s1585_s26 }
   0xa   : > { %p935_p6 = scmp.ge.s32.totalorder %s1251_s23, 1  ;;  %p147_p7 = scmp.eq.s32.totalorder %s146_s29, 0 }
   0xb   : > { %p1335_p8 = por %p166_p5, %p165_p3  ;;  %p209_p9 = scmp.lt.s32.totalorder %s1251_s23, 3 }
   0xc   : > { %s1341_s6 = scalar_select %p147_p7, %s1239_s20, %s149_s27  }
   0xd   : > { %p210_p10 = pnand %p935_p6, %p209_p9 }
   0xe   : > { %v272_v0 = vld [vmem:[%s1572_s1] sm:$0xff] (!%p210_p10)  ;;  %v273_v1 = vld [vmem:[%s1572_s1 + $0x8] sm:$0xff] (!%p210_p10)  ;;  %v274_v2 = vld [vmem:[%s1572_s1 + $0x10] sm:$0xff] (!%p210_p10)  ;;  %p242_p11 = scmp.lt.s32.totalorder (!%p210_p10), %s1243_s21, 1  ;;  %vm276_vm0 = vcmask (!%p210_p10), 261120   ;;  %vm255_vm1 = vcmask (!%p210_p10), 523264  }
   0xf   : > { %213 = sbr.rel (%p210_p10) target bundleno = 900 (0x384), region = 40  ;;  %v1039_v3 = vpack.c.bf16 (!%p210_p10), %v273_v1, %v272_v0  ;;  %v275_v4 = vld [vmem:[%s1572_s1 + $0x18] sm:$0xff] (!%p210_p10)  ;;  %v948_v16 = vld [vmem:[%s1573_s2] ss:$0 sm:$0xff] (!%p210_p10)  ;;  %vm260_vm2 = vcmask (!%p210_p10), 516096   ;;  %vm1254_vm4 = vmmov (!%p210_p10), 1  }
  0x10   : > { %v1043_v5 = vpack.c.bf16 (!%p210_p10), %v275_v4, %v274_v2  ;;  %v949_v19 = vld [vmem:[%s1574_s3] ss:$0 sm:$0xff] (!%p210_p10)  ;;  %vm675_vm6 = vcmask (!%p210_p10), 654336   ;;  %s238_s17 = sand.u32 (!%p210_p10), 1, %s1235_s19   ;;  %s1255_s11 = smov (!%p210_p10), [#allocation4]  }
  0x11   : > { %1040 = vmatprep.subr.bf16.mxu0 (!%p210_p10), %v1039_v3  ;;  %s936_s24 = sshll.u32 (!%p210_p10), %s238_s17, 5  ;;  %s1177_s12 = sshll.u32 (!%p210_p10), %s1255_s11, 4  ;;  %s1178_s12 = int_to_ptr.vmem [resolvable:$false] %s1177_s12 }
  0x12   : > { %1042 = vmatpush3.bf16.msra.mxu0 (!%p210_p10), %v1039_v3  ;;  %s240_s27 = scalar_lea.vmem (!%p210_p10), [#allocation4], %s936_s24  ;;  %s1179_s13 = scalar_lea.vmem (!%p210_p10), %s1178_s12, 1024 }
  0x13   : > { %1044 = vmatprep.subr.bf16.mxu0 (!%p210_p10), %v1043_v5  ;;  %s855_s29 = sshll.u32 (!%p210_p10), %s240_s27, 4  ;;  %s1519_s29 = int_to_ptr.vmem [resolvable:$true] %s855_s29 }
  0x14   : > { %s1173_s10 = scalar_lea.vmem (!%p210_p10), %s1519_s29, 512  ;;  %p1180_p1 = scmp.lt.s32.totalorder (!%p210_p10), %s1519_s29, %s1178_s12 }
  0x15   : > { %p1174_p12 = scmp.ne.s32.totalorder (!%p210_p10), %s1519_s29, %s1173_s10  ;;  %p1181_p2 = scmp.lt.s32.totalorder (!%p210_p10), %s1179_s13, %s1173_s10 }
  0x16   : > { %s243_s15 = scalar_select %p242_p11, %s1243_s21, 1  ;;  %1046 = vmatpush3.bf16.msra.mxu0 %v1043_v5 }
  0x17   : > { %p1175_p13 = pnand %p1174_p12, %p1328_p4  ;;  %p1182_p3 = por %p1181_p2, %p1180_p1 }
  0x18   : > { %s1069_s16 = smul.u32 80, %s243_s15 }
  0x19   : > { %p1176_p0 = pneg %p1175_p13 }
  0x1a   : > { %s249_s25 = scalar_lea.vmem %s1571_s0, %s1069_s16 }
  0x1b   : > { %v1360_v6 = vld [vmem:[%s249_s25] sm:$0xff]  ;;  %v1364_v7 = vld [vmem:[%s249_s25 + $0x8] sm:$0xff]  ;;  %v1366_v8 = vld [vmem:[%s249_s25 + $0x10] sm:$0xff]  ;;  %p1183_p5 = pnand %p1182_p3, %p1176_p0 }
  0x1c   : > { %998 = vmatprep.mubr.msk.f32.mxu0 %vm276_vm0, %v1360_v6  ;;  %v1372_v9 = vld [vmem:[%s249_s25 + $0x18] sm:$0xff]  ;;  %v1374_v10 = vld [vmem:[%s249_s25 + $0x20] sm:$0xff]  ;;  %v1380_v11 = vld [vmem:[%s249_s25 + $0x28] sm:$0xff] }
  0x1d   : > { %999 = vmatmul.mubr.msk.f32.vlgmr.msra.gmra.mrb[0].mxu0 %vm276_vm0, %v1364_v7  ;;  %v1382_v12 = vld [vmem:[%s249_s25 + $0x30] sm:$0xff]  ;;  %v1388_v13 = vld [vmem:[%s249_s25 + $0x38] sm:$0xff]  ;;  %v1390_v14 = vld [vmem:[%s249_s25 + $0x40] sm:$0xff] }
  0x1e   : > { %1001 = vmatprep.mubr.msk.f32.mxu0 %vm276_vm0, %v1366_v8  ;;  %v1396_v15 = vld [vmem:[%s249_s25 + $0x48] sm:$0xff]  ;;  %s961_s25 = sshll.u32 %s1243_s21, 9  ;;  %s1525_s21 = scalar_lea.sflag [#allocation5], %s238_s17 }
  0x1f   : > { %s1517_s9 = scalar_lea.hbm %s1576_s5, %s961_s25 }
  0x21   : > { %1002 = vmatmul.mubr.msk.f32.gmra.mrb[2].mxu0 %vm276_vm0, %v1372_v9 }
  0x22   : > { %1004 = vmatprep.mubr.msk.f32.mxu0 %vm276_vm0, %v1374_v10 }
  0x25   : > { %1005 = vmatmul.mubr.msk.f32.gmra.mrb[4].mxu0 %vm276_vm0, %v1380_v11 }
  0x26   : > { %1007 = vmatprep.mubr.msk.f32.mxu0 %vm276_vm0, %v1382_v12 }
  0x29   : > { %1008 = vmatmul.mubr.msk.f32.gmra.mrb[6].mxu0 %vm276_vm0, %v1388_v13 }
  0x2a   : > { %1010 = vmatprep.mubr.msk.f32.mxu0 %vm276_vm0, %v1390_v14 }
  0x2d   : > { %1011 = vmatmul.mubr.msk.f32.gmra.mrb[8].mxu0 %vm276_vm0, %v1396_v15 }
  0xf0   : > { %v1000_v17 = vpop.f32.mrb[0].mxu0 }
  0xf1   : > { %v373_v18 = vpop.f32.mrb[1].mxu0  ;;  %v430_v20 = vmul.f32 %v1000_v17, %v948_v16 }
  0xf2   : > { %v429_v21 = vmul.f32 %v948_v16, %v373_v18 }
  0xf3   : > { %v447_v28 = vadd.f32 %v949_v19, %v430_v20 }
  0xf4   : > { %v1003_v22 = vpop.f32.mrb[2].mxu0  ;;  %v446_v23 = vadd.f32 %v949_v19, %v429_v21 }
  0xf5   : > { %v432_v24 = vmul.f32 %v1003_v22, %v948_v16  ;;  %v383_v25 = vpop.f32.mrb[3].mxu0  ;;  %v460_v36 = vsel %vm255_vm1, %v447_v28, -inf }
  0xf6   : > { %v431_v26 = vmul.f32 %v948_v16, %v383_v25  ;;  %v457_v27 = vsel %vm255_vm1, %v446_v23, -inf }
  0xf7   : > { %458 = vmax.xlane.f32.xlu0 %v457_v27  ;;  %v449_v29 = vadd.f32 %v949_v19, %v432_v24 }
  0xf8   : > { %v1006_v30 = vpop.f32.mrb[4].mxu0  ;;  %v448_v34 = vadd.f32 %v949_v19, %v431_v26 }
  0xf9   : > { %v434_v31 = vmul.f32 %v1006_v30, %v948_v16  ;;  %v393_v32 = vpop.f32.mrb[5].mxu0  ;;  %v466_v33 = vsel %vm255_vm1, %v449_v29, -inf }
  0xfa   : > { %v433_v35 = vmul.f32 %v948_v16, %v393_v32  ;;  %467 = vmax.xlane.f32.xlu1 %v466_v33  ;;  %v463_v42 = vsel %vm255_vm1, %v448_v34, -inf }
  0xfb   : > { %461 = vmax.xlane.f32.xlu0 %v460_v36  ;;  %v451_v37 = vadd.f32 %v949_v19, %v434_v31 }
  0xfc   : > { %v1009_v38 = vpop.f32.mrb[6].mxu0  ;;  %v450_v39 = vadd.f32 %v949_v19, %v433_v35 }
  0xfd   : > { %v436_v40 = vmul.f32 %v1009_v38, %v948_v16  ;;  %v403_v41 = vpop.f32.mrb[7].mxu0  ;;  %v472_v45 = vsel %vm255_vm1, %v451_v37, -inf }
  0xfe   : > { %v435_v43 = vmul.f32 %v948_v16, %v403_v41  ;;  %464 = vmax.xlane.f32.xlu1 %v463_v42  ;;  %v469_v44 = vsel %vm255_vm1, %v450_v39, -inf }
  0xff   : > { %470 = vmax.xlane.f32.xlu0 %v469_v44  ;;  %v453_v46 = vadd.f32 %v949_v19, %v436_v40 }
 0x100   : > { %v1012_v47 = vpop.f32.mrb[8].mxu0  ;;  %v452_v48 = vadd.f32 %v949_v19, %v435_v43 }
 0x101   : > { %v438_v49 = vmul.f32 %v1012_v47, %v948_v16  ;;  %v413_v50 = vpop.f32.mrb[9].mxu0  ;;  %v478_v53 = vsel %vm255_vm1, %v453_v46, -inf }
 0x102   : > { %v437_v51 = vmul.f32 %v948_v16, %v413_v50  ;;  %473 = vmax.xlane.f32.xlu1 %v472_v45  ;;  %v475_v52 = vsel %vm255_vm1, %v452_v48, -inf }
 0x103   : > { %476 = vmax.xlane.f32.xlu0 %v475_v52  ;;  %v455_v54 = vadd.f32 %v949_v19, %v438_v49 }
 0x104   : > { %v454_v55 = vadd.f32 %v949_v19, %v437_v51 }
 0x105   : > { %v484_v57 = vsel %vm255_vm1, %v455_v54, -inf }
 0x106   : > { %479 = vmax.xlane.f32.xlu1 %v478_v53  ;;  %v481_v56 = vsel %vm255_vm1, %v454_v55, -inf }
 0x107   : > { %482 = vmax.xlane.f32.xlu0 %v481_v56 }
 0x10a   : > { %485 = vmax.xlane.f32.xlu1 %v484_v57  ;;  %v568_v57 = vlaneseq }
 0x184   : > { %v459_v58 = vpop.xlane.xlu0 %458 }
 0x185   : > { %v487_v59 = vsub.f32 %v446_v23, %v459_v58 }
 0x187   : > { %v497_v60 = vmul.f32 1.442695, %v487_v59  ;;  %v468_v61 = vpop.xlane.xlu1 %467 }
 0x188   : > { %v490_v62 = vsub.f32 %v449_v29, %v468_v61  ;;  %v462_v63 = vpop.xlane.xlu0 %461 }
 0x189   : > { %1129 = vpow2.f32 %v497_v60  ;;  %v488_v0 = vsub.f32 %v447_v28, %v462_v63 }
 0x18a   : > { %v503_v1 = vmul.f32 1.442695, %v490_v62 }
 0x18b   : > { %v499_v2 = vmul.f32 1.442695, %v488_v0  ;;  %v465_v3 = vpop.xlane.xlu1 %464 }
 0x18c   : > { %v489_v4 = vsub.f32 %v448_v34, %v465_v3  ;;  %v471_v5 = vpop.xlane.xlu0 %470 }
 0x18d   : > { %1131 = vpow2.f32 %v499_v2  ;;  %v491_v16 = vsub.f32 %v450_v39, %v471_v5  ;;  %v569_v5 = vshrl.u32 %v568_v57, 7 }
 0x18e   : > { %v501_v17 = vmul.f32 1.442695, %v489_v4  ;;  %1133 = vpow2.f32 %v503_v1 }
 0x18f   : > { %v505_v18 = vmul.f32 1.442695, %v491_v16  ;;  %v474_v19 = vpop.xlane.xlu1 %473 }
 0x190   : > { %1135 = vpow2.f32 %v501_v17  ;;  %v492_v20 = vsub.f32 %v451_v37, %v474_v19  ;;  %v477_v21 = vpop.xlane.xlu0 %476 }
 0x191   : > { %v493_v22 = vsub.f32 %v452_v48, %v477_v21  ;;  %1137 = vpow2.f32 %v505_v18 }
 0x192   : > { %v507_v23 = vmul.f32 1.442695, %v492_v20 }
 0x193   : > { %v1416_v24 = vpop.eup %1129  ;;  %v509_v25 = vmul.f32 1.442695, %v493_v22  ;;  %v480_v26 = vpop.xlane.xlu1 %479 }
 0x194   : > { %1139 = vpow2.f32 %v507_v23  ;;  %v494_v27 = vsub.f32 %v453_v46, %v480_v26  ;;  %v483_v28 = vpop.xlane.xlu0 %482  ;;  %v517_v29 = vsel %vm255_vm1, %v1416_v24, 0.0 }
 0x195   : > { %v495_v30 = vsub.f32 %v454_v55, %v483_v28  ;;  %518 = vadd.xlane.f32.xlu0 %v517_v29  ;;  %1141 = vpow2.f32 %v509_v25  ;;  %v578_v25 = vadd.s32 72, %v569_v5 }
 0x196   : > { %v511_v31 = vmul.f32 1.442695, %v494_v27 }
 0x197   : > { %v1420_v32 = vpop.eup %1131  ;;  %v513_v33 = vmul.f32 1.442695, %v495_v30  ;;  %v486_v34 = vpop.xlane.xlu1 %485  ;;  %vm599_vm3 = vcmp.lt.s32.totalorder %v578_v25, 73 }
 0x198   : > { %1143 = vpow2.f32 %v511_v31  ;;  %v496_v35 = vsub.f32 %v455_v54, %v486_v34  ;;  %v520_v36 = vsel %vm255_vm1, %v1420_v32, 0.0  ;;  %v1424_v37 = vpop.eup %1133  ;;  %v1253_v54 = vmov 0.0   ;;  %vm1064_vm5 = vmpackc.low %vm599_vm3, %vm1254_vm4 }
 0x199   : > { %521 = vadd.xlane.f32.xlu1 %v520_v36  ;;  %1145 = vpow2.f32 %v513_v33  ;;  %v526_v42 = vsel %vm255_vm1, %v1424_v37, 0.0  ;;  %261 = vst.msk [vmem:[#allocation3] sm:$0x1] %vm260_vm2, %v1253_v54 }
 0x19a   : > { %v1426_v38 = vpop.eup %1135  ;;  %v515_v39 = vmul.f32 1.442695, %v496_v35  ;;  %256 = vst.msk [vmem:[#allocation2] sm:$0xff] %vm255_vm1, %v1253_v54  ;;  %257 = vst.msk [vmem:[#allocation2 + $0x8] sm:$0xff] %vm255_vm1, %v1253_v54 }
 0x19b   : > { %v523_v40 = vsel %vm255_vm1, %v1426_v38, 0.0  ;;  %v1430_v41 = vpop.eup %1137  ;;  %258 = vst.msk [vmem:[#allocation2 + $0x10] sm:$0xff] %vm255_vm1, %v1253_v54  ;;  %259 = vst.msk [vmem:[#allocation2 + $0x18] sm:$0xff] %vm255_vm1, %v1253_v54 }
 0x19c   : > { %1147 = vpow2.f32 %v515_v39  ;;  %524 = vadd.xlane.f32.xlu0 %v523_v40  ;;  %v529_v44 = vsel %vm255_vm1, %v1430_v41, 0.0 }
 0x19d   : > { %527 = vadd.xlane.f32.xlu1 %v526_v42 }
 0x19e   : > { %v1434_v43 = vpop.eup %1139 }
 0x19f   : > { %v532_v45 = vsel %vm255_vm1, %v1434_v43, 0.0  ;;  %v1440_v46 = vpop.eup %1141 }
 0x1a0   : > { %530 = vadd.xlane.f32.xlu0 %v529_v44  ;;  %v535_v48 = vsel %vm255_vm1, %v1440_v46, 0.0 }
 0x1a1   : > { %533 = vadd.xlane.f32.xlu1 %v532_v45 }
 0x1a2   : > { %v1442_v47 = vpop.eup %1143  ;;  %v642_v57 = vld [vmem:[#allocation2 + $0x18] sm:$0xff] }
 0x1a3   : > { %v538_v49 = vsel %vm255_vm1, %v1442_v47, 0.0  ;;  %v1448_v50 = vpop.eup %1145 }
 0x1a4   : > { %536 = vadd.xlane.f32.xlu0 %v535_v48  ;;  %v541_v52 = vsel %vm255_vm1, %v1448_v50, 0.0 }
 0x1a5   : > { %539 = vadd.xlane.f32.xlu1 %v538_v49 }
 0x1a6   : > { %v1450_v51 = vpop.eup %1147 }
 0x1a7   : > { %v544_v53 = vsel %vm255_vm1, %v1450_v51, 0.0 }
 0x1a8   : > { %542 = vadd.xlane.f32.xlu0 %v541_v52 }
 0x1a9   : > { %545 = vadd.xlane.f32.xlu1 %v544_v53 }
 0x1d5   : > { %643 = vxpose.xlu0.b32.start [1/10] (short) (narrow) %v1360_v6, 32 }
 0x1d9   : > { %644 = vxpose.xlu0.b32.cont [2/10] (short) (narrow) %v1364_v7, 32 }
 0x1dd   : > { %645 = vxpose.xlu0.b32.cont [3/10] (short) (narrow) %v1366_v8, 32 }
 0x1e1   : > { %646 = vxpose.xlu0.b32.cont [4/10] (short) (narrow) %v1372_v9, 32 }
 0x1e5   : > { %647 = vxpose.xlu0.b32.cont [5/10] (short) (narrow) %v1374_v10, 32 }
 0x1e9   : > { %648 = vxpose.xlu0.b32.cont [6/10] (short) (narrow) %v1380_v11, 32 }
 0x1ed   : > { %649 = vxpose.xlu0.b32.cont [7/10] (short) (narrow) %v1382_v12, 32 }
 0x1f1   : > { %650 = vxpose.xlu0.b32.cont [8/10] (short) (narrow) %v1388_v13, 32 }
 0x1f5   : > { %651 = vxpose.xlu0.b32.cont [9/10] (short) (narrow) %v1390_v14, 32 }
 0x1f9   : > { %652 = vxpose.xlu0.b32.end [10/10] (short) (narrow) %v1396_v15, 32 }
 0x222   : > { %v519_v55 = vpop.xlane.xlu0 %518 }
 0x223   : > { %1149 = vrcp.f32 %v519_v55  ;;  %v610_v55 = vld [vmem:[#allocation3] sm:$0x1] }
 0x226   : > { %v522_v6 = vpop.xlane.xlu1 %521 }
 0x227   : > { %1151 = vrcp.f32 %v522_v6 }
 0x229   : > { %v525_v7 = vpop.xlane.xlu0 %524 }
 0x22a   : > { %1153 = vrcp.f32 %v525_v7  ;;  %v528_v8 = vpop.xlane.xlu1 %527 }
 0x22b   : > { %1155 = vrcp.f32 %v528_v8 }
 0x22d   : > { %v1150_v9 = vpop.eup %1149  ;;  %v531_v10 = vpop.xlane.xlu0 %530 }
 0x22e   : > { %1157 = vrcp.f32 %v531_v10  ;;  %v534_v11 = vpop.xlane.xlu1 %533  ;;  %v548_v12 = vmul.f32 %v1150_v9, %v1416_v24 }
 0x22f   : > { %1159 = vrcp.f32 %v534_v11  ;;  %v640_v11 = vld [vmem:[#allocation2 + $0x8] sm:$0xff] }
 0x230   : > { %v611_v59 = vsel %vm255_vm1, %v548_v12, 0.0 }
 0x231   : > { %v1152_v13 = vpop.eup %1151  ;;  %v537_v56 = vpop.xlane.xlu0 %536 }
 0x232   : > { %1161 = vrcp.f32 %v537_v56  ;;  %v540_v14 = vpop.xlane.xlu1 %539  ;;  %v550_v15 = vmul.f32 %v1152_v13, %v1420_v32 }
 0x233   : > { %1163 = vrcp.f32 %v540_v14 }
 0x234   : > { %v1154_v58 = vpop.eup %1153  ;;  %v612_v60 = vsel %vm255_vm1, %v550_v15, 0.0  ;;  %v1047_v61 = vpack.c.bf16 %v550_v15, %v548_v12  ;;  %v639_v12 = vld [vmem:[#allocation2] sm:$0xff] }
 0x235   : > { %v1156_v62 = vpop.eup %1155  ;;  %v543_v63 = vpop.xlane.xlu0 %542  ;;  %v613_v0 = vadd.f32 %v612_v60, %v611_v59  ;;  %v552_v1 = vmul.f32 %v1154_v58, %v1426_v38  ;;  %v789_v58 = vld [vmem:[%s1575_s4] sm:$0xff]  ;;  %v641_v59 = vld [vmem:[#allocation2 + $0x10] sm:$0xff] }
 0x236   : > { %1165 = vrcp.f32 %v543_v63  ;;  %v546_v2 = vpop.xlane.xlu1 %545  ;;  %1048 = vmatprep.subr.bf16.mxu1 %v1047_v61  ;;  %v554_v3 = vmul.f32 %v1156_v62, %v1424_v37 }
 0x237   : > { %1167 = vrcp.f32 %v546_v2  ;;  %1050 = vmatpush3.bf16.msra.mxu1 %v1047_v61  ;;  %v614_v4 = vsel %vm255_vm1, %v552_v1, 0.0  ;;  %v790_v61 = vld [vmem:[%s1575_s4 + $0x8] sm:$0xff] }
 0x238   : > { %v1158_v16 = vpop.eup %1157  ;;  %v615_v17 = vadd.f32 %v614_v4, %v613_v0  ;;  %v616_v18 = vsel %vm255_vm1, %v554_v3, 0.0  ;;  %v1051_v19 = vpack.c.bf16 %v554_v3, %v552_v1 }
 0x239   : > { %v1160_v20 = vpop.eup %1159  ;;  %v556_v21 = vmul.f32 %v1158_v16, %v1430_v41 }
 0x23a   : > { %v617_v22 = vadd.f32 %v616_v18, %v615_v17  ;;  %1052 = vmatprep.subr.bf16.mxu1 %v1051_v19  ;;  %v558_v23 = vmul.f32 %v1160_v20, %v1434_v43  ;;  %v792_v18 = vld [vmem:[%s1575_s4 + $0x18] sm:$0xff] }
 0x23b   : > { %1054 = vmatpush3.bf16.msra.mxu1 %v1051_v19  ;;  %v618_v24 = vsel %vm255_vm1, %v556_v21, 0.0  ;;  %v791_v19 = vld [vmem:[%s1575_s4 + $0x10] sm:$0xff] }
 0x23c   : > { %v1162_v26 = vpop.eup %1161  ;;  %v619_v27 = vadd.f32 %v618_v24, %v617_v22  ;;  %v620_v28 = vsel %vm255_vm1, %v558_v23, 0.0  ;;  %v1055_v29 = vpack.c.bf16 %v558_v23, %v556_v21 }
 0x23d   : > { %v1164_v30 = vpop.eup %1163  ;;  %v560_v31 = vmul.f32 %v1162_v26, %v1440_v46 }
 0x23e   : > { %v621_v32 = vadd.f32 %v620_v28, %v619_v27  ;;  %1056 = vmatprep.subr.bf16.mxu1 %v1055_v29  ;;  %v562_v33 = vmul.f32 %v1164_v30, %v1442_v47 }
 0x23f   : > { %1058 = vmatpush3.bf16.msra.mxu1 %v1055_v29  ;;  %v622_v34 = vsel %vm255_vm1, %v560_v31, 0.0 }
 0x240   : > { %v1166_v35 = vpop.eup %1165  ;;  %v623_v36 = vadd.f32 %v622_v34, %v621_v32  ;;  %v624_v37 = vsel %vm255_vm1, %v562_v33, 0.0  ;;  %v1059_v38 = vpack.c.bf16 %v562_v33, %v560_v31 }
 0x241   : > { %v1168_v39 = vpop.eup %1167  ;;  %v564_v40 = vmul.f32 %v1166_v35, %v1448_v50 }
 0x242   : > { %v625_v41 = vadd.f32 %v624_v37, %v623_v36  ;;  %1060 = vmatprep.subr.bf16.mxu1 %v1059_v38  ;;  %v566_v42 = vmul.f32 %v1168_v39, %v1450_v51 }
 0x243   : > { %1062 = vmatpush3.bf16.msra.mxu1 %v1059_v38  ;;  %v626_v43 = vsel %vm255_vm1, %v564_v40, 0.0 }
 0x244   : > { %v609_v44 = vsel %vm599_vm3, %v566_v42, 0.0  ;;  %v627_v45 = vadd.f32 %v626_v43, %v625_v41  ;;  %v1063_v46 = vpack.c.bf16 %v566_v42, %v564_v40 }
 0x245   : > { %v628_v47 = vsel %vm255_vm1, %v609_v44, 0.0 }
 0x246   : > { %v629_v48 = vadd.f32 %v628_v47, %v627_v45  ;;  %1065 = vmatprep.subr.msk.bf16.mxu1 %vm1064_vm5, %v1063_v46 }
 0x247   : > { %1068 = vmatpush3.bf16.msk.msra.mxu1 %vm1064_vm5, %v1063_v46 }
 0x248   : > { %v630_v49 = vrot.slane %v629_v48, 4 }
 0x24a   : > { %v631_v52 = vadd.f32 %v630_v49, %v629_v48 }
 0x24c   : > { %v632_v50 = vrot.slane %v631_v52, 2 }
 0x24e   : > { %v633_v53 = vadd.f32 %v632_v50, %v631_v52 }
 0x250   : > { %v634_v54 = vrot.slane %v633_v53, 1 }
 0x252   : > { %v635_v51 = vadd.f32 %v634_v54, %v633_v53 }
 0x254   : > { %v636_v6 = vadd.f32 %v635_v51, %v610_v55 }
 0x255   : > { %v659_v7 = vpop.trf.xlu0 }
 0x256   : > { %638 = vst.msk [vmem:[#allocation3] sm:$0x1] %vm260_vm2, %v636_v6  ;;  %1033 = vmatprep.mubr.msk.f32.mxu1 %vm675_vm6, %v659_v7 }
 0x259   : > { %v660_v8 = vpop.trf.xlu0 }
 0x25a   : > { %1034 = vmatmul.mubr.msk.f32.vlgmr.msra.gmra.mrb[0].mxu1 %vm675_vm6, %v660_v8 }
 0x25d   : > { %v661_v9 = vpop.trf.xlu0  ;;  %v955_v60 = vld [vmem:[#allocation3] ss:$0 sm:$0xff] }
 0x25e   : > { %1036 = vmatprep.mubr.msk.f32.mxu1 %vm675_vm6, %v661_v9  ;;  %v799_v3 = vmul.f32 %v955_v60, %v789_v58  ;;  %v800_v4 = vmul.f32 %v955_v60, %v790_v61  ;;  %v802_v22 = vmul.f32 %v955_v60, %v792_v18  ;;  %v801_v24 = vmul.f32 %v955_v60, %v791_v19 }
 0x261   : > { %v662_v10 = vpop.trf.xlu0 }
 0x262   : > { %1037 = vmatmul.mubr.msk.f32.gmra.mrb[2].mxu1 %vm675_vm6, %v662_v10 }
 0x32d   : > { %v1035_v13 = vpop.f32.mrb[0].mxu1 }
 0x32e   : > { %v774_v56 = vadd.f32 %v1035_v13, %v640_v11  ;;  %v754_v14 = vpop.f32.mrb[1].mxu1 }
 0x32f   : > { %v773_v15 = vadd.f32 %v754_v14, %v639_v12 }
 0x330   : > { %778 = vst.msk [vmem:[#allocation2 + $0x8] sm:$0xff] %vm255_vm1, %v774_v56 }
 0x331   : > { %777 = vst.msk [vmem:[#allocation2] sm:$0xff] %vm255_vm1, %v773_v15 }
 0x335   : > { %v1038_v62 = vpop.f32.mrb[2].mxu1 }
 0x336   : > { %v776_v63 = vadd.f32 %v1038_v62, %v642_v57  ;;  %v764_v0 = vpop.f32.mrb[3].mxu1 }
 0x337   : > { %v775_v1 = vadd.f32 %v764_v0, %v641_v59  ;;  %v785_v2 = vld [vmem:[#allocation2 + $0x8] sm:$0xff] }
 0x338   : > { %780 = vst.msk [vmem:[#allocation2 + $0x18] sm:$0xff] %vm255_vm1, %v776_v63  ;;  %v784_v5 = vld [vmem:[#allocation2] sm:$0xff]  ;;  %v804_v17 = vsub.f32 %v785_v2, %v800_v4 }
 0x339   : > { %779 = vst.msk [vmem:[#allocation2 + $0x10] sm:$0xff] %vm255_vm1, %v775_v1  ;;  %v803_v16 = vsub.f32 %v784_v5, %v799_v3 }
 0x33a   : > { %v808_v21 = vmul.f32 %v804_v17, %v804_v17 }
 0x33b   : > { %v807_v20 = vmul.f32 %v803_v16, %v803_v16 }
 0x33c   : > { %v812_v29 = vsel %vm255_vm1, %v808_v21, 0.0 }
 0x33d   : > { %v811_v28 = vsel %vm255_vm1, %v807_v20, 0.0 }
 0x33e   : > { %v813_v32 = vadd.f32 %v812_v29, %v811_v28 }
 0x33f   : > { %v787_v23 = vld [vmem:[#allocation2 + $0x18] sm:$0xff] }
 0x340   : > { %v786_v25 = vld [vmem:[#allocation2 + $0x10] sm:$0xff]  ;;  %v806_v26 = vsub.f32 %v787_v23, %v802_v22 }
 0x341   : > { %v805_v27 = vsub.f32 %v786_v25, %v801_v24 }
 0x342   : > { %v810_v31 = vmul.f32 %v806_v26, %v806_v26 }
 0x343   : > { %v809_v30 = vmul.f32 %v805_v27, %v805_v27 }
 0x344   : > { %v816_v35 = vsel %vm255_vm1, %v810_v31, 0.0 }
 0x345   : > { %v814_v33 = vsel %vm255_vm1, %v809_v30, 0.0 }
 0x346   : > { %v815_v34 = vadd.f32 %v814_v33, %v813_v32 }
 0x348   : > { %v817_v36 = vadd.f32 %v816_v35, %v815_v34 }
 0x34a   : > { %v818_v37 = vrot.slane %v817_v36, 4 }
 0x34c   : > { %v819_v38 = vadd.f32 %v818_v37, %v817_v36 }
 0x34e   : > { %v820_v39 = vrot.slane %v819_v38, 2 }
 0x350   : > { %v821_v40 = vadd.f32 %v820_v39, %v819_v38 }
 0x352   : > { %v822_v41 = vrot.slane %v821_v40, 1 }
 0x354   : > { %v823_v42 = vadd.f32 %v822_v41, %v821_v40 }
 0x356   : > { %1169 = vrsqrt.f32 %v823_v42  ;;  %vm826_vm7 = vcmp.eq.f32.partialorder %v823_v42, inf  ;;  %v829_v45 = vand.u32 2147483648, %v823_v42  ;;  %vm828_vm8 = vcmp.eq.f32.partialorder %v823_v42, 0.0 }
 0x360   : > { %v1170_v43 = vpop.eup %1169 }
 0x361   : > { %v825_v44 = vmul.f32 %v1170_v43, %v823_v42 }
 0x363   : > { %v827_v46 = vsel %vm826_vm7, %v823_v42, %v825_v44 }
 0x364   : > { %v830_v47 = vsel %vm828_vm8, %v829_v45, %v827_v46 }
 0x365   : > { %v831_v48 = vmax.f32 %v830_v47, 1e-12 }
 0x367   : > { %1171 = vrcp.f32 %v831_v48 }
 0x371   : > { %v1172_v49 = vpop.eup %1171 }
 0x372   : > { %v833_v52 = vmul.f32 %v1172_v49, %v803_v16  ;;  %v834_v50 = vmul.f32 %v1172_v49, %v804_v17  ;;  %v835_v53 = vmul.f32 %v1172_v49, %v805_v27  ;;  %v836_v54 = vmul.f32 %v1172_v49, %v806_v26 }
 0x374   : > { %837 = vst.msk [vmem:[%s240_s27] sm:$0xff] %vm255_vm1, %v833_v52  ;;  %838 = vst.msk [vmem:[%s240_s27 + $0x8] sm:$0xff] %vm255_vm1, %v834_v50 }
 0x375   : > { %839 = vst.msk [vmem:[%s240_s27 + $0x10] sm:$0xff] %vm255_vm1, %v835_v53  ;;  %840 = vst.msk [vmem:[%s240_s27 + $0x18] sm:$0xff] %vm255_vm1, %v836_v54 }
 0x376   : > { %1186 = shalt.err (!%p1183_p5)
}
 0x377   : > { %s1187_s14 = scalar_lea.hbm %s1517_s9, 512  ;;  %s1191_s17 = scalar_lea.hbm %s1576_s5, 1024 }
 0x378   : > { %p1188_p6 = scmp.ne.s32.totalorder %s1517_s9, %s1187_s14  ;;  %p1192_p10 = scmp.lt.u32.totalorder %s1517_s9, %s1576_s5 }
 0x379   : > { %p1193_p11 = scmp.lt.u32.totalorder %s1191_s17, %s1187_s14  ;;  %p1195_p13 = scmp.lt.u32.totalorder %s1187_s14, %s1517_s9 }
 0x37a   : > { %p1189_p7 = pnand %p1188_p6, %p1328_p4 }
 0x37b   : > { %p1194_p12 = por %p1193_p11, %p1192_p10 }
 0x37c   : > { %p1190_p9 = pneg %p1189_p7 }
 0x37d   : > { %p1196_p0 = por %p1195_p13, %p1194_p12 }
 0x37f   : > { %p1197_p1 = pnand %p1196_p0, %p1190_p9 }
 0x381   : > { %1200 = shalt.err (!%p1197_p1)
}
 0x382   : > { %s1256_s27 = smov 128   ;;  %s1257_s7 = smov 8  }
 0x383   : > { %1070 = dma.vmem_to_hbm [thread:$0]  (%p1328_p4), %s1519_s29, 512, %s1517_s9, %s1525_s21, %s1256_s27, %s1256_s27, %s1257_s7  }
 0x384 PF: > { %p1076_p2 = scmp.ge.s32.totalorder %s1251_s23, 2  ;;  %s870_s8 = sand.u32 1, %s1231_s18  }
 0x385   : > { %s871_s10 = scalar_lea.sflag [#allocation5], %s870_s8 }
 0x386   : > { %p1073_p3 = pnand %p1076_p2, %p1335_p8 }
 0x388   : > { %1226 = dma.done.wait (!%p1073_p3), %s871_s10, 512  }
 0x389   : > { %1228 = vsyncadd (!%p1073_p3), %s871_s10, 4294966784  ;;  %s18_s23 = sadd.s32 1, %s1251_s23   ;;  %s1579_s18 = smov %s1235_s19 }
 0x38a   : > { %p15_p5 = scmp.ge.s32.totalorder %s18_s23, 4   ;;  %s1580_s19 = smov %s1239_s20 }
 0x38b   : > { %s1581_s20 = smov %s1341_s6  ;;  %s1582_s21 = smov %s1247_s22 }
 0x38c   : > { %s1583_s22 = smov %s1585_s26  ;;  %17 = sbr.rel (!%p15_p5) target bundleno = 4 (0x4), region = 83 }
 0x393   :  { %876 = vsyncpa [#allocation5], 1 }
 0x394   :  { %878 = vsyncpa [#allocation5 + $0x1], 1 }

</bundles_post_ra>
